<compile_context>
chip_gen: v6e
topology: v6e:2x2x1
jax: 0.10.0
libtpu: 0.0.40
codegen_flags: <defaults>
</compile_context>

<pallas_src>
import functools

import jax
import jax.numpy as jnp
from jax import lax
from jax.experimental import pallas as pl
from jax.experimental.pallas import tpu as pltpu


# ----------------------------- kernels -----------------------------

def _conv_downsample_kernel(x_ref, wA_ref, wB_ref, wCD_ref, wE_ref, b_ref,
                            out_ref, *, C, Hout, Wout):
    """3x3 / stride-2 / padding-1 conv on a space-to-depth input block.

    x_ref   : [1, Hout+1, Wout+1, 4*C] (bf16) padded input, 2x2 blocks folded
              into channels, channel order = (row-parity, col-parity, C)
    wA_ref  : [4*C, tn]  taps (0,0),(0,1),(1,0),(1,1) stacked along K
    wB_ref  : [2*C, tn]  taps (2,0),(2,1)
    wCD_ref : [3*C, tn]  taps (0,2), <zeros>, (1,2)   (zero block keeps the
              channel slice contiguous / lane-aligned)
    wE_ref  : [C,   tn]  tap (2,2)
    b_ref   : [1, tn]    (f32)
    out_ref : [1, Hout, Wout, tn] (f32)
    """
    x = x_ref[0]                                          # [Hout+1, Wout+1, 4C]
    tn = out_ref.shape[-1]
    dn = (((2,), (0,)), ((), ()))

    # init accumulator with the broadcast bias (no separate zero + add pass)
    acc = jnp.broadcast_to(b_ref[...].astype(jnp.float32), (Hout, Wout, tn))

    # taps (0,0),(0,1),(1,0),(1,1): full 4C channel slice of block (oh, ow)
    acc = acc + lax.dot_general(x[:Hout, :Wout, :], wA_ref[...], dn,
                                preferred_element_type=jnp.float32)
    # taps (2,0),(2,1): block (oh+1, ow), channels [0:2C]
    acc = acc + lax.dot_general(x[1:, :Wout, :2 * C], wB_ref[...], dn,
                                preferred_element_type=jnp.float32)
    # taps (0,2),(1,2): block (oh, ow+1), channels [0:3C] (middle C zeroed in W)
    acc = acc + lax.dot_general(x[:Hout, 1:, :3 * C], wCD_ref[...], dn,
                                preferred_element_type=jnp.float32)
    # tap (2,2): block (oh+1, ow+1), channels [0:C]
    acc = acc + lax.dot_general(x[1:, 1:, :C], wE_ref[...], dn,
                                preferred_element_type=jnp.float32)

    out_ref[...] = acc[None].astype(out_ref.dtype)


def _avgpool_downsample_kernel(x_ref, out_ref, *, C):
    """2x2 / stride-2 average pool on a space-to-depth input block.

    x_ref  : [1, Hout, Wout, 4*C]
    out_ref: [1, Hout, Wout, C]
    """
    x = x_ref[0]
    s = (x[..., 0 * C:1 * C] + x[..., 1 * C:2 * C]
         + x[..., 2 * C:3 * C] + x[..., 3 * C:4 * C]) * 0.25
    out_ref[...] = s[None].astype(out_ref.dtype)


# ----------------------------- wrappers -----------------------------

def _pick_cout_tile(cout):
    """Cout tile: whole thing if small, else a 128-multiple tile <= 256."""
    if cout <= 256:
        return cout
    for tn in (256, 128):
        if cout % tn == 0:
            return tn
    return cout


def downsample_conv_2d(x, weight, bias):
    """Downsample(use_conv=True, dims=2): x [B,C,H,W] -> [B,Cout,H//2,W//2]."""
    B, C, H, W = x.shape
    # TODO(synk): odd H/W (handled by PyTorch) and dims=1/3 are not implemented.
    assert H % 2 == 0 and W % 2 == 0, "even spatial dims expected"
    Cout = weight.shape[0]
    Hout, Wout = H // 2, W // 2

    # Single layout pass: pad in NCHW, then one reshape/transpose/reshape into
    # the space-to-depth NHWC layout, cast to bf16 in the same fusion.
    x_pad = jnp.pad(x, ((0, 0), (0, 0), (1, 1), (1, 1)))          # [B,C,H+2,W+2]
    x_s2d = (x_pad.reshape(B, C, Hout + 1, 2, Wout + 1, 2)
             .transpose(0, 2, 4, 3, 5, 1)
             .reshape(B, Hout + 1, Wout + 1, 4 * C)
             .astype(jnp.bfloat16))                               # [B,Ho+1,Wo+1,4C]

    # torch conv weight [Cout, Cin, 3, 3] -> per-tap [Cin, Cout], packed along K
    # to match the fused in-kernel channel slices.
    w_t = jnp.transpose(weight, (2, 3, 1, 0))                     # [3,3,Cin,Cout]
    w_A = jnp.concatenate([w_t[0, 0], w_t[0, 1], w_t[1, 0], w_t[1, 1]],
                          axis=0).astype(jnp.bfloat16)            # [4C, Cout]
    w_B = jnp.concatenate([w_t[2, 0], w_t[2, 1]],
                          axis=0).astype(jnp.bfloat16)            # [2C, Cout]
    w_CD = jnp.concatenate([w_t[0, 2],
                            jnp.zeros((C, Cout), w_t.dtype),
                            w_t[1, 2]], axis=0).astype(jnp.bfloat16)  # [3C, Cout]
    w_E = w_t[2, 2].astype(jnp.bfloat16)                          # [C, Cout]
    b_row = bias.reshape(1, Cout).astype(jnp.float32)

    tn = _pick_cout_tile(Cout)
    n_j = Cout // tn

    kernel = functools.partial(_conv_downsample_kernel, C=C, Hout=Hout, Wout=Wout)

    bytes_accessed = (x_s2d.size * 2 + (10 * C * Cout) * 2 + Cout * 4
                      + B * Hout * Wout * Cout * 4)
    out_nhwc = pl.pallas_call(
        kernel,
        out_shape=jax.ShapeDtypeStruct((B, Hout, Wout, Cout), jnp.float32),
        grid=(B, n_j),
        in_specs=[
            pl.BlockSpec((1, Hout + 1, Wout + 1, 4 * C), lambda b, j: (b, 0, 0, 0)),
            pl.BlockSpec((4 * C, tn), lambda b, j: (0, j)),
            pl.BlockSpec((2 * C, tn), lambda b, j: (0, j)),
            pl.BlockSpec((3 * C, tn), lambda b, j: (0, j)),
            pl.BlockSpec((C, tn), lambda b, j: (0, j)),
            pl.BlockSpec((1, tn), lambda b, j: (0, j)),
        ],
        out_specs=pl.BlockSpec((1, Hout, Wout, tn), lambda b, j: (b, 0, 0, j)),
        compiler_params=pltpu.CompilerParams(
            dimension_semantics=("parallel", "parallel"),
            vmem_limit_bytes=64 * 1024 * 1024),
        cost_estimate=pl.CostEstimate(
            flops=2 * B * Hout * Wout * 10 * C * Cout,
            transcendentals=0,
            bytes_accessed=bytes_accessed),
    )(x_s2d, w_A, w_B, w_CD, w_E, b_row)

    return jnp.transpose(out_nhwc, (0, 3, 1, 2))          # back to NCHW


def downsample_avgpool_2d(x):
    """Downsample(use_conv=False, dims=2): x [B,C,H,W] -> [B,C,H//2,W//2]."""
    B, C, H, W = x.shape
    assert H % 2 == 0 and W % 2 == 0, "even spatial dims expected"
    Hout, Wout = H // 2, W // 2

    # Single layout pass: NCHW -> space-to-depth NHWC in one reshape/transpose.
    x_s2d = (x.reshape(B, C, Hout, 2, Wout, 2)
             .transpose(0, 2, 4, 3, 5, 1)
             .reshape(B, Hout, Wout, 4 * C))              # [B, Hout, Wout, 4C]

    kernel = functools.partial(_avgpool_downsample_kernel, C=C)
    out_nhwc = pl.pallas_call(
        kernel,
        out_shape=jax.ShapeDtypeStruct((B, Hout, Wout, C), jnp.float32),
        grid=(B,),
        in_specs=[pl.BlockSpec((1, Hout, Wout, 4 * C), lambda b: (b, 0, 0, 0))],
        out_specs=pl.BlockSpec((1, Hout, Wout, C), lambda b: (b, 0, 0, 0)),
        compiler_params=pltpu.CompilerParams(dimension_semantics=("parallel",)),
    )(x_s2d)
    # TODO(synk): when C < 128 the pool's output stores are lane-masked; a
    # Wout*C-fused output layout would make them dense but needs an in-kernel
    # relayout — skipped since this path is purely bandwidth-bound anyway.
    return jnp.transpose(out_nhwc, (0, 3, 1, 2))          # back to NCHW


# ----------------------------- pure-JAX references -----------------------------

def ref_downsample_conv_2d(x, weight, bias):
    out = lax.conv_general_dilated(
        x, weight, window_strides=(2, 2), padding=((1, 1), (1, 1)),
        dimension_numbers=('NCHW', 'OIHW', 'NCHW'),
        precision=lax.Precision.HIGHEST)
    return out + bias[None, :, None, None]


def ref_downsample_avgpool_2d(x):
    B, C, H, W = x.shape
    return x.reshape(B, C, H // 2, 2, W // 2, 2).mean(axis=(3, 5))


if __name__ == "__main__":
    key = jax.random.PRNGKey(0)
    B, C, H, W = 2, 32, 16, 16      # small shapes; 4*C = 128 keeps lanes dense
    Cout = 64

    k0, k1, k2 = jax.random.split(key, 3)
    x = jax.random.normal(k0, (B, C, H, W), jnp.float32)
    w = jax.random.normal(k1, (Cout, C, 3, 3), jnp.float32) * 0.05
    b = jax.random.normal(k2, (Cout,), jnp.float32) * 0.05

    out_conv = jax.block_until_ready(downsample_conv_2d(x, w, b))   # use_conv=True
    out_pool = jax.block_until_ready(downsample_avgpool_2d(x))      # use_conv=False

    ref_conv = ref_downsample_conv_2d(x, w, b)
    ref_pool = ref_downsample_avgpool_2d(x)

    assert out_conv.shape == (B, Cout, H // 2, W // 2), out_conv.shape
    assert out_pool.shape == (B, C, H // 2, W // 2), out_pool.shape
    # conv path runs bf16 operands with f32 accumulation -> loose tolerance
    assert jnp.allclose(out_conv, ref_conv, atol=5e-2, rtol=5e-2), (
        f"conv max abs diff = {jnp.max(jnp.abs(out_conv - ref_conv))}")
    assert jnp.allclose(out_pool, ref_pool, atol=1e-5, rtol=1e-5), (
        f"pool max abs diff = {jnp.max(jnp.abs(out_pool - ref_pool))}")
    print("KERNEL_OK")
</pallas_src>

<mosaic_0001>
module attributes {stable_mosaic.version = 11 : i64} {
  func.func @_conv_downsample_kernel(%arg0: i32, %arg1: i32, %arg2: memref<1x9x9x128xbf16, #tpu.memory_space<vmem>>, %arg3: memref<128x64xbf16, #tpu.memory_space<vmem>>, %arg4: memref<64x64xbf16, #tpu.memory_space<vmem>>, %arg5: memref<96x64xbf16, #tpu.memory_space<vmem>>, %arg6: memref<32x64xbf16, #tpu.memory_space<vmem>>, %arg7: memref<1x64xf32, #tpu.memory_space<vmem>>, %arg8: memref<1x8x8x64xf32, #tpu.memory_space<vmem>>) attributes {dimension_semantics = [#tpu.dimension_semantics<parallel>, #tpu.dimension_semantics<parallel>], iteration_bounds = array<i64: 2, 1>, scalar_prefetch = 0 : i64, scratch_operands = 0 : i64, tpu.core_type = #tpu.core_type<tc>, window_params = [{transform_indices = @transform_0, window_bounds = array<i64: 1, 9, 9, 128>}, {transform_indices = @transform_1, window_bounds = array<i64: 128, 64>}, {transform_indices = @transform_2, window_bounds = array<i64: 64, 64>}, {transform_indices = @transform_3, window_bounds = array<i64: 96, 64>}, {transform_indices = @transform_4, window_bounds = array<i64: 32, 64>}, {transform_indices = @transform_5, window_bounds = array<i64: 1, 64>}, {transform_indices = @transform_6, window_bounds = array<i64: 1, 8, 8, 64>}]} {
    %c0 = arith.constant 0 : index
    %c0_0 = arith.constant 0 : index
    %c0_1 = arith.constant 0 : index
    %c0_2 = arith.constant 0 : index
    %0 = vector.load %arg2[%c0, %c0_0, %c0_1, %c0_2] : memref<1x9x9x128xbf16, #tpu.memory_space<vmem>>, vector<1x9x9x128xbf16>
    %1 = vector.shape_cast %0 : vector<1x9x9x128xbf16> to vector<9x9x128xbf16>
    %c0_3 = arith.constant 0 : index
    %c0_4 = arith.constant 0 : index
    %2 = vector.load %arg7[%c0_3, %c0_4] : memref<1x64xf32, #tpu.memory_space<vmem>>, vector<1x64xf32>
    %3 = vector.shape_cast %2 : vector<1x64xf32> to vector<1x1x64xf32>
    %4 = vector.broadcast %3 : vector<1x1x64xf32> to vector<8x8x64xf32>
    %5 = vector.extract_strided_slice %1 {offsets = [0, 0, 0], sizes = [8, 8, 128], strides = [1, 1, 1]} : vector<9x9x128xbf16> to vector<8x8x128xbf16>
    %c0_5 = arith.constant 0 : index
    %c0_6 = arith.constant 0 : index
    %6 = vector.load %arg3[%c0_5, %c0_6] : memref<128x64xbf16, #tpu.memory_space<vmem>>, vector<128x64xbf16>
    %cst = arith.constant dense<0.000000e+00> : vector<8x8x64xf32>
    %7 = tpu.matmul %5, %6, %cst {dimension_numbers = #tpu.dot_dimension_numbers<[2], [0], [0, 1], [1], [0, 0, 0, 1, 1, 1], [], []>} : vector<8x8x128xbf16>, vector<128x64xbf16>, vector<8x8x64xf32> -> vector<8x8x64xf32>
    %8 = arith.addf %4, %7 : vector<8x8x64xf32>
    %9 = vector.extract_strided_slice %1 {offsets = [1, 0, 0], sizes = [8, 8, 64], strides = [1, 1, 1]} : vector<9x9x128xbf16> to vector<8x8x64xbf16>
    %c0_7 = arith.constant 0 : index
    %c0_8 = arith.constant 0 : index
    %10 = vector.load %arg4[%c0_7, %c0_8] : memref<64x64xbf16, #tpu.memory_space<vmem>>, vector<64x64xbf16>
    %cst_9 = arith.constant dense<0.000000e+00> : vector<8x8x64xf32>
    %11 = tpu.matmul %9, %10, %cst_9 {dimension_numbers = #tpu.dot_dimension_numbers<[2], [0], [0, 1], [1], [0, 0, 0, 1, 1, 1], [], []>} : vector<8x8x64xbf16>, vector<64x64xbf16>, vector<8x8x64xf32> -> vector<8x8x64xf32>
    %12 = arith.addf %8, %11 : vector<8x8x64xf32>
    %13 = vector.extract_strided_slice %1 {offsets = [0, 1, 0], sizes = [8, 8, 96], strides = [1, 1, 1]} : vector<9x9x128xbf16> to vector<8x8x96xbf16>
    %c0_10 = arith.constant 0 : index
    %c0_11 = arith.constant 0 : index
    %14 = vector.load %arg5[%c0_10, %c0_11] : memref<96x64xbf16, #tpu.memory_space<vmem>>, vector<96x64xbf16>
    %cst_12 = arith.constant dense<0.000000e+00> : vector<8x8x64xf32>
    %15 = tpu.matmul %13, %14, %cst_12 {dimension_numbers = #tpu.dot_dimension_numbers<[2], [0], [0, 1], [1], [0, 0, 0, 1, 1, 1], [], []>} : vector<8x8x96xbf16>, vector<96x64xbf16>, vector<8x8x64xf32> -> vector<8x8x64xf32>
    %16 = arith.addf %12, %15 : vector<8x8x64xf32>
    %17 = vector.extract_strided_slice %1 {offsets = [1, 1, 0], sizes = [8, 8, 32], strides = [1, 1, 1]} : vector<9x9x128xbf16> to vector<8x8x32xbf16>
    %c0_13 = arith.constant 0 : index
    %c0_14 = arith.constant 0 : index
    %18 = vector.load %arg6[%c0_13, %c0_14] : memref<32x64xbf16, #tpu.memory_space<vmem>>, vector<32x64xbf16>
    %cst_15 = arith.constant dense<0.000000e+00> : vector<8x8x64xf32>
    %19 = tpu.matmul %17, %18, %cst_15 {dimension_numbers = #tpu.dot_dimension_numbers<[2], [0], [0, 1], [1], [0, 0, 0, 1, 1, 1], [], []>} : vector<8x8x32xbf16>, vector<32x64xbf16>, vector<8x8x64xf32> -> vector<8x8x64xf32>
    %20 = arith.addf %16, %19 : vector<8x8x64xf32>
    %21 = vector.shape_cast %20 : vector<8x8x64xf32> to vector<1x8x8x64xf32>
    %c0_16 = arith.constant 0 : index
    %c0_17 = arith.constant 0 : index
    %c0_18 = arith.constant 0 : index
    %c0_19 = arith.constant 0 : index
    %22 = vector.load %arg8[%c0_16, %c0_17, %c0_18, %c0_19] : memref<1x8x8x64xf32, #tpu.memory_space<vmem>>, vector<1x8x8x64xf32>
    tpu.vector_store %arg8[%c0_16, %c0_17, %c0_18, %c0_19], %21 {strides = array<i32>} : memref<1x8x8x64xf32, #tpu.memory_space<vmem>>, vector<1x8x8x64xf32>,
    return
  }
  func.func @transform_0(%arg0: i32, %arg1: i32) -> (i32, i32, i32, i32) {
    %c0_i32 = arith.constant 0 : i32
    %c0_i32_0 = arith.constant 0 : i32
    %c0_i32_1 = arith.constant 0 : i32
    %c0_i32_2 = arith.constant 0 : i32
    return %arg0, %c0_i32, %c0_i32_0, %c0_i32_1 : i32, i32, i32, i32
  }
  func.func @transform_1(%arg0: i32, %arg1: i32) -> (i32, i32) {
    %c0_i32 = arith.constant 0 : i32
    %c0_i32_0 = arith.constant 0 : i32
    return %c0_i32, %arg1 : i32, i32
  }
  func.func @transform_2(%arg0: i32, %arg1: i32) -> (i32, i32) {
    %c0_i32 = arith.constant 0 : i32
    %c0_i32_0 = arith.constant 0 : i32
    return %c0_i32, %arg1 : i32, i32
  }
  func.func @transform_3(%arg0: i32, %arg1: i32) -> (i32, i32) {
    %c0_i32 = arith.constant 0 : i32
    %c0_i32_0 = arith.constant 0 : i32
    return %c0_i32, %arg1 : i32, i32
  }
  func.func @transform_4(%arg0: i32, %arg1: i32) -> (i32, i32) {
    %c0_i32 = arith.constant 0 : i32
    %c0_i32_0 = arith.constant 0 : i32
    return %c0_i32, %arg1 : i32, i32
  }
  func.func @transform_5(%arg0: i32, %arg1: i32) -> (i32, i32) {
    %c0_i32 = arith.constant 0 : i32
    %c0_i32_0 = arith.constant 0 : i32
    return %c0_i32, %arg1 : i32, i32
  }
  func.func @transform_6(%arg0: i32, %arg1: i32) -> (i32, i32, i32, i32) {
    %c0_i32 = arith.constant 0 : i32
    %c0_i32_0 = arith.constant 0 : i32
    %c0_i32_1 = arith.constant 0 : i32
    return %arg0, %c0_i32, %c0_i32_0, %arg1 : i32, i32, i32, i32
  }
}

</mosaic_0001>

<bundles_post_ra>
// kernel: tpu_custom_call.1
= control target key start
LH: loop header
LB: loop body
LE: loop exit
PB: predicated region body
PF: predicated region fallthrough
CT: control target
= control target key end

     0   :  { %11 = vsyncpa [#allocation3], 0  ;;  %s1895_s0 = inlined_call_operand.vmem [shape: bf16[2,9,9,128], index: 0, kind: input, shape index: {}]   ;;  %s1896_s1 = inlined_call_operand.vmem [shape: bf16[128,64], index: 1, kind: input, shape index: {}]   ;;  %s1897_s2 = inlined_call_operand.vmem [shape: bf16[64,64], index: 2, kind: input, shape index: {}]   ;;  %s1898_s3 = inlined_call_operand.vmem [shape: bf16[96,64], index: 3, kind: input, shape index: {}]   ;;  %s1899_s4 = inlined_call_operand.vmem [shape: bf16[32,64], index: 4, kind: input, shape index: {}]   ;;  %s1900_s5 = inlined_call_operand.vmem [shape: f32[1,64], index: 5, kind: input, shape index: {}]   ;;  %s1901_s6 = inlined_call_operand.hbm [shape: f32[2,8,8,64], index: 6, kind: output, shape index: {}]  }
   0x1   :  { %13 = vsyncpa [#allocation3 + $0x1], 0  ;;  %s1583_s21 = smov 0   ;;  %s1585_s22 = smov 0  }
   0x2   :  { %s1587_s23 = smov 0   ;;  %s1589_s24 = smov 0  }
   0x3   :  { %s1591_s25 = smov 0   ;;  %s1593_s26 = smov 0  }
   0x4 LB: > { %s1206_s27 = sadd.s32 4294967295, %s1543_s26   ;;  %s1207_s28 = sadd.s32 4294967294, %s1543_s26   ;;  %s1543_s26 = sphi %s1593_s26, %s19_s26   ;;  %s1539_s25 = sphi %s1591_s25, %s1910_s25   ;;  %s1535_s24 = sphi %s1589_s24, %s1909_s24   ;;  %s1531_s23 = sphi %s1587_s23, %s1908_s23   ;;  %s1527_s22 = sphi %s1585_s22, %s1907_s22   ;;  %s1523_s21 = sphi %s1583_s21, %s1906_s21  }
   0x5   : > { %s31_s29 = sadd.s32 1, %s1539_s25  ;;  %s196_s30 = sadd.s32 1, %s1531_s23 }
   0x6   : > { %p33_p0 = scmp.ge.s32.totalorder %s31_s29, 2  ;;  %p206_p1 = scmp.ne.s32.totalorder %s1531_s23, %s1527_s22 }
   0x7   : > { %p207_p2 = scmp.eq.s32.totalorder %s1206_s27, 1  ;;  %p212_p3 = scmp.ne.s32.totalorder %s1527_s22, %s1523_s21 }
   0x8   : > { %s1912_s29 = smov (%p33_p0, %s31_s29), 0  ;;  %p213_p5 = scmp.eq.s32.totalorder %s1207_s28, 1 }
   0x9   : > { %p1623_p4 = por %p207_p2, %p206_p1  ;;  %s191_s8 = ssub.s32 %s1539_s25, %s1912_s29 }
   0xa   : > { %p1215_p6 = scmp.ge.s32.totalorder %s1543_s26, 1  ;;  %p194_p7 = scmp.eq.s32.totalorder %s191_s8, 0 }
   0xb   : > { %p1630_p8 = por %p213_p5, %p212_p3  ;;  %p273_p9 = scmp.lt.s32.totalorder %s1543_s26, 3 }
   0xc   : > { %s1636_s10 = scalar_select %p194_p7, %s1531_s23, %s196_s30  }
   0xd   : > { %p274_p10 = pnand %p1215_p6, %p273_p9 }
   0xe   : > { %p322_p11 = scmp.lt.s32.totalorder (!%p274_p10), %s1535_s24, 1  ;;  %s1272_s20 = sshll.u32 (!%p274_p10), %s1535_s24, 10 }
   0xf   : > { %277 = sbr.rel (%p274_p10) target bundleno = 292 (0x124), region = 44  ;;  %s1840_s8 = scalar_lea.hbm (!%p274_p10), %s1901_s6, %s1272_s20 }
  0x10   : > { %s1545_s12 = smov (!%p274_p10), [#allocation2]  }
  0x11   : > { %s1471_s14 = sshll.u32 (!%p274_p10), %s1545_s12, 4  ;;  %s1472_s14 = int_to_ptr.vmem [resolvable:$false] %s1471_s14 }
  0x12   : > { %s1473_s15 = scalar_lea.vmem (!%p274_p10), %s1472_s14, 2048 }
  0x14   : > { %v1439_v0 = vld [vmem:[%s1896_s1 + $0x38] sm:$0xff]   ;;  %v1441_v2 = vld [vmem:[%s1896_s1 + $0x30] sm:$0xff]   ;;  %s323_s17 = scalar_select %p322_p11, %s1535_s24, 1  ;;  %v1443_v4 = vld [vmem:[%s1896_s1 + $0x28] sm:$0xff]   ;;  %vm571_vm0 = vcmask 523264   ;;  %vm832_vm3 = vcmask 785408  }
  0x15   : > { %v1440_v1 = vld [vmem:[%s1897_s2 + $0x18] sm:$0xff]   ;;  %1309 = vmatprep.subr.bf16.mxu0 %v1439_v0  ;;  %v1442_v3 = vld [vmem:[%s1897_s2 + $0x10] sm:$0xff]   ;;  %v1444_v5 = vld [vmem:[%s1897_s2 + $0x8] sm:$0xff]   ;;  %vm669_vm1 = vsmask.f32 3328  ;;  %vm953_vm5 = vcmask 261120  }
  0x16   : > { %1333 = vmatprep.subr.bf16.mxu1 %v1440_v1  ;;  %1310 = vmatpush3.bf16.msra.mxu0 %v1439_v0  ;;  %s1381_s28 = smul.u32 72, %s323_s17  ;;  %v1445_v6 = vld [vmem:[%s1896_s1 + $0x20] sm:$0xff]   ;;  %v1447_v12 = vld [vmem:[%s1896_s1 + $0x18] sm:$0xff]   ;;  %v1449_v20 = vld [vmem:[%s1898_s3 + $0x28] sm:$0xff]   ;;  %vm670_vm2 = vsmask.f32 7440 }
  0x17   : > { %1334 = vmatpush3.bf16.msra.mxu1 %v1440_v1  ;;  %1311 = vmatprep.subr.bf16.mxu0 %v1441_v2  ;;  %v1446_v7 = vld [vmem:[%s1897_s2] sm:$0xff]   ;;  %v1451_v28 = vld [vmem:[%s1896_s1 + $0x10] sm:$0xff]   ;;  %v1453_v37 = vld [vmem:[%s1896_s1 + $0x8] sm:$0xff]   ;;  %s319_s17 = sand.u32 1, %s1527_s22  }
  0x18   : > { %1335 = vmatprep.subr.bf16.mxu1 %v1442_v3  ;;  %s1661_s13 = scalar_lea.vmem %s1895_s0, %s1381_s28  ;;  %v1452_v31 = vld [vmem:[%s1898_s3 + $0x20] sm:$0xff]   ;;  %v1454_v39 = vld [vmem:[%s1898_s3 + $0x18] sm:$0xff]   ;;  %v1456_v57 = vld [vmem:[%s1898_s3 + $0x10] sm:$0xff]   ;;  %s1216_s18 = sshll.u32 %s319_s17, 6 }
  0x19   : > { %v1670_v8 = vld [vmem:[%s1661_s13 + $0x8] sm:$0xf]  ;;  %v1673_v9 = vld [vmem:[%s1661_s13 + $0x10] sm:$0xf]  ;;  %v352_v16 = vld [vmem:[%s1661_s13 + $0x14] sm:$0x1] }
  0x1a   : > { %1312 = vmatpush3.bf16.msra.mxu0 %v1441_v2  ;;  %v1231_v10 = vcombine.low %v1670_v8, %v1673_v9  ;;  %v687_v11 = vshrl.u32 %v1670_v8, 16  ;;  %v690_v13 = vshll.u32 %v1670_v8, 16  ;;  %v701_v14 = vshrl.u32 %v1673_v9, 16  ;;  %v1686_v17 = vld [vmem:[%s1661_s13 + $0x18] sm:$0xf]  ;;  %v1455_v48 = vld [vmem:[%s1896_s1] sm:$0xff]   ;;  %vm1762_vm4 = vmor %vm669_vm1, %vm670_vm2 }
  0x1b   : > { %1336 = vmatpush3.bf16.msra.mxu1 %v1442_v3  ;;  %1313 = vmatprep.subr.bf16.mxu0 %v1443_v4  ;;  %v704_v15 = vshll.u32 %v1673_v9, 16  ;;  %v1693_v21 = vld [vmem:[%s1661_s13 + $0x20] sm:$0xf]  ;;  %v715_v24 = vshrl.u32 %v1686_v17, 16  ;;  %v718_v25 = vshll.u32 %v1686_v17, 16  ;;  %v710_v26 = vshll.u32 %v352_v16, 16 }
  0x1c   : > { %1337 = vmatprep.subr.bf16.mxu1 %v1444_v5  ;;  %1341 = vmatprep.mubr.msk.bf16.mxu1 %vm571_vm0, %v1231_v10  ;;  %v689_v18 = vrot.slane %v687_v11, 4  ;;  %v692_v19 = vrot.slane %v690_v13, 5  ;;  %v703_v22 = vrot.slane %v701_v14, 4  ;;  %v1232_v27 = vcombine.low %v1686_v17, %v1693_v21  ;;  %v347_v40 = vld [vmem:[%s1661_s13] sm:$0xf]  ;;  %v1461_v2 = vld [vmem:[%s1898_s3 + $0x8] sm:$0xff]  }
  0x1d   : > { %v706_v23 = vrot.slane %v704_v15, 5  ;;  %v717_v29 = vrot.slane %v715_v24, 4  ;;  %v720_v30 = vrot.slane %v718_v25, 5  ;;  %v729_v34 = vshrl.u32 %v1693_v21, 16  ;;  %v1719_v44 = vld [vmem:[%s1661_s13 + $0x28] sm:$0xf] }
  0x1e   : > { %1314 = vmatpush3.bf16.msra.mxu0 %v1443_v4  ;;  %v693_v32 = vor.u32 %v692_v19, %v689_v18  ;;  %v732_v36 = vshll.u32 %v1693_v21, 16  ;;  %v1711_v38 = vrot.slane %v710_v26, 5  ;;  %v1219_v41 = vcombine.low %v347_v40, %v1670_v8  ;;  %v1722_v45 = vld [vmem:[%s1661_s13 + $0x30] sm:$0xf]  ;;  %v1732_v50 = vld [vmem:[%s1661_s13 + $0x38] sm:$0xf] }
  0x1f   : > { %1338 = vmatpush3.bf16.msra.mxu1 %v1444_v5  ;;  %1315 = vmatprep.subr.bf16.mxu0 %v1445_v6  ;;  %v707_v33 = vor.u32 %v706_v23, %v703_v22  ;;  %v721_v35 = vor.u32 %v720_v30, %v717_v29  ;;  %v673_v42 = vshrl.u32 %v347_v40, 16  ;;  %v676_v43 = vshll.u32 %v347_v40, 16  ;;  %v1737_v55 = vld [vmem:[%s1661_s13 + $0x40] sm:$0xf]  ;;  %v1462_v3 = vld [vmem:[%s1899_s4 + $0x8] sm:$0xff]   ;;  %s1821_s19 = scalar_lea.vmem [#allocation2], %s1216_s18 }
  0x20   : > { %1339 = vmatprep.subr.bf16.mxu1 %v1446_v7  ;;  %v694_v46 = vrot.slane %v693_v32, 4  ;;  %v1233_v49 = vcombine.low %v1719_v44, %v1722_v45  ;;  %v731_v51 = vrot.slane %v729_v34, 4  ;;  %1325 = vmatprep.mubr.bf16.mxu0 %v1219_v41  ;;  %v734_v56 = vrot.slane %v732_v36, 5  ;;  %v348_v4 = vld [vmem:[%s1661_s13 + $0x4] sm:$0x1]  ;;  %s1062_s27 = sshll.u32 %s1821_s19, 4  ;;  %s1842_s27 = int_to_ptr.vmem [resolvable:$true] %s1062_s27 }
  0x21   : > { %v1724_v47 = vrot.slane %v707_v33, 4  ;;  %v1734_v52 = vrot.slane %v721_v35, 4  ;;  %v675_v53 = vrot.slane %v673_v42, 4  ;;  %v678_v54 = vrot.slane %v676_v43, 5  ;;  %v350_v5 = vld [vmem:[%s1661_s13 + $0xc] sm:$0x1]  ;;  %p1474_p1 = scmp.lt.s32.totalorder %s1842_s27, %s1472_s14 }
  0x22   : > { %1316 = vmatpush3.bf16.msra.mxu0 %v1445_v6  ;;  %v743_v58 = vshrl.u32 %v1719_v44, 16  ;;  %v746_v59 = vshll.u32 %v1719_v44, 16  ;;  %v757_v60 = vshrl.u32 %v1722_v45, 16  ;;  %v1234_v61 = vcombine.low %v1732_v50, %v1737_v55  ;;  %v354_v10 = vld [vmem:[%s1661_s13 + $0x1c] sm:$0x1]  ;;  %v1463_v29 = vld [vmem:[%s1898_s3] sm:$0xff]  }
  0x23   : > { %1340 = vmatpush3.bf16.msra.mxu1 %v1446_v7  ;;  %1317 = vmatprep.subr.bf16.mxu0 %v1447_v12  ;;  %v679_v62 = vor.u32 %v678_v54, %v675_v53  ;;  %v760_v63 = vshll.u32 %v1722_v45, 16  ;;  %v771_v0 = vshrl.u32 %v1732_v50, 16  ;;  %v735_v6 = vor.u32 %v734_v56, %v731_v51  ;;  %v356_v15 = vld [vmem:[%s1661_s13 + $0x24] sm:$0x1]  ;;  %v362_v35 = vld [vmem:[%s1661_s13 + $0x3c] sm:$0x1] }
  0x24   : > { %1349 = vmatprep.subr.bf16.mxu1 %v1449_v20  ;;  %v682_v7 = vshll.u32 %v348_v4, 16  ;;  %v696_v8 = vshll.u32 %v350_v5, 16  ;;  %v774_v13 = vshll.u32 %v1732_v50, 16  ;;  %v724_v14 = vshll.u32 %v354_v10, 16  ;;  %v1218_v11 = vld [vmem:[%s1900_s5] ss:$0 sm:$0xff] }
  0x25   : > { %v680_v1 = vrot.slane %v679_v62, 4  ;;  %v1221_v16 = vcombine.low %v1693_v21, %v1719_v44  ;;  %v738_v22 = vshll.u32 %v356_v15, 16  ;;  %v736_v23 = vrot.slane %v735_v6, 4  ;;  %v360_v21 = vld [vmem:[%s1661_s13 + $0x34] sm:$0x1]  ;;  %s1850_s24 = scalar_lea.sflag [#allocation3], %s319_s17 }
  0x26   : > { %1318 = vmatpush3.bf16.msra.mxu0 %v1447_v12  ;;  %1342 = vmatmul.mubr.msk.bf16.vlgmr.msra.gmra.mxu1 %vm571_vm0, %v1232_v27  ;;  %v1220_v12 = vcombine.low %v1673_v9, %v1686_v17  ;;  %v684_v18 = vrot.slane %v682_v7, 5  ;;  %v698_v19 = vrot.slane %v696_v8, 5  ;;  %v745_v24 = vrot.slane %v743_v58, 4  ;;  %v364_v62 = vld [vmem:[%s1661_s13 + $0x44] sm:$0x1]  ;;  %s1467_s11 = scalar_lea.vmem %s1842_s27, 1024 }
  0x27   : > { %1350 = vmatpush3.bf16.msra.mxu1 %v1449_v20  ;;  %1319 = vmatprep.subr.bf16.mxu0 %v1451_v28  ;;  %v358_v20 = vld [vmem:[%s1661_s13 + $0x2c] sm:$0x1]  ;;  %v748_v25 = vrot.slane %v746_v59, 5  ;;  %v726_v27 = vrot.slane %v724_v14, 5  ;;  %v740_v32 = vrot.slane %v738_v22, 5  ;;  %v713_v36 = vsel %vm1762_vm4, %v1724_v47, %v1711_v38  ;;  %p1468_p12 = scmp.ne.s32.totalorder %s1842_s27, %s1467_s11  ;;  %p1475_p2 = scmp.lt.s32.totalorder %s1473_s15, %s1467_s11 }
  0x28   : > { %1351 = vmatprep.subr.bf16.mxu1 %v1452_v31  ;;  %1345 = vmatprep.mubr.msk.bf16.mxu1 %vm571_vm0, %v1233_v49  ;;  %v752_v26 = vshll.u32 %v358_v20, 16  ;;  %v685_v9 = vsel %vm1762_vm4, %v680_v1, %v684_v18  ;;  %v699_v17 = vsel %vm1762_vm4, %v694_v46, %v698_v19  ;;  %v926_v40 = vshll.u32 %v1737_v55, 16 }
  0x29   : > { %v1243_v30 = vcombine.low %v685_v9, %v699_v17  ;;  %v749_v33 = vor.u32 %v748_v25, %v745_v24  ;;  %v766_v42 = vshll.u32 %v360_v21, 16  ;;  %v773_v43 = vrot.slane %v771_v0, 4  ;;  %p1469_p13 = pnand %p1468_p12, %p1623_p4  ;;  %p1476_p3 = por %p1475_p2, %p1474_p1 }
  0x2a   : > { %1320 = vmatpush3.bf16.msra.mxu0 %v1451_v28  ;;  %v759_v28 = vrot.slane %v757_v60, 4  ;;  %v754_v34 = vrot.slane %v752_v26, 5  ;;  %v727_v44 = vsel %vm1762_vm4, %v1734_v52, %v726_v27  ;;  %v776_v38 = vrot.slane %v774_v13, 5 }
  0x2b   : > { %1352 = vmatpush3.bf16.msra.mxu1 %v1452_v31  ;;  %1321 = vmatprep.subr.bf16.mxu0 %v1453_v37  ;;  %v1466_v31 = vld [vmem:[%s1899_s4] sm:$0xff]   ;;  %v750_v41 = vrot.slane %v749_v33, 4  ;;  %v780_v47 = vshll.u32 %v362_v35, 16  ;;  %v1222_v53 = vcombine.low %v1722_v45, %v1732_v50  ;;  %v1244_v52 = vcombine.low %v713_v36, %v727_v44  ;;  %p1470_p0 = pneg %p1469_p13 }
  0x2c   : > { %1353 = vmatprep.subr.bf16.mxu1 %v1454_v39  ;;  %v777_v54 = vor.u32 %v776_v38, %v773_v43  ;;  %v1257_v56 = vcombine.low %v699_v17, %v713_v36  ;;  %v932_v45 = vshll.u32 %v364_v62, 16 }
  0x2d   : > { %v755_v49 = vsel %vm1762_vm4, %v750_v41, %v754_v34  ;;  %p1477_p5 = pnand %p1476_p3, %p1470_p0 }
  0x2e   : > { %1322 = vmatpush3.bf16.msra.mxu0 %v1453_v37  ;;  %1346 = vmatmul.mubr.msk.bf16.gmra.mxu1 %vm571_vm0, %v1234_v61  ;;  %v923_v37 = vshrl.u32 %v1737_v55, 16  ;;  %v928_v55 = vrot.slane %v926_v40, 5  ;;  %v778_v60 = vrot.slane %v777_v54, 4  ;;  %v782_v61 = vrot.slane %v780_v47, 5 }
  0x2f   : > { %1354 = vmatpush3.bf16.msra.mxu1 %v1454_v39  ;;  %1323 = vmatprep.subr.bf16.mxu0 %v1455_v48  ;;  %v762_v39 = vrot.slane %v760_v63, 5  ;;  %v934_v5 = vrot.slane %v932_v45, 5 }
  0x30   : > { %1355 = vmatprep.subr.bf16.mxu1 %v1456_v57  ;;  %1361 = vmatprep.mubr.msk.bf16.mxu1 %vm832_vm3, %v1243_v30  ;;  %v925_v51 = vrot.slane %v923_v37, 4  ;;  %v783_v0 = vsel %vm1762_vm4, %v778_v60, %v782_v61 }
  0x31   : > { %v763_v46 = vor.u32 %v762_v39, %v759_v28 }
  0x32   : > { %1324 = vmatpush3.bf16.msra.mxu0 %v1455_v48  ;;  %v741_v48 = vsel %vm1762_vm4, %v736_v23, %v740_v32  ;;  %v929_v63 = vor.u32 %v928_v55, %v925_v51 }
  0x33   : > { %1356 = vmatpush3.bf16.msra.mxu1 %v1456_v57  ;;  %1369 = vmatprep.subr.bf16.mxu0 %v1462_v3  ;;  %v768_v57 = vrot.slane %v766_v42, 5  ;;  %v1245_v58 = vcombine.low %v741_v48, %v755_v49  ;;  %v764_v59 = vrot.slane %v763_v46, 4  ;;  %v1258_v1 = vcombine.low %v727_v44, %v741_v48 }
  0x34   : > { %1357 = vmatprep.subr.bf16.mxu1 %v1461_v2  ;;  %v930_v4 = vrot.slane %v929_v63, 4 }
  0x35   : > { %1326 = vmatmul.mubr.bf16.vlgmr.msra.gmra.mxu0 %v1220_v12  ;;  %v769_v50 = vsel %vm1762_vm4, %v764_v59, %v768_v57 }
  0x36   : > { %1370 = vmatpush3.bf16.msra.mxu0 %v1462_v3  ;;  %1329 = vmatprep.mubr.bf16.mxu0 %v1221_v16  ;;  %v1259_v3 = vcombine.low %v755_v49, %v769_v50  ;;  %v935_v6 = vsel %vm1762_vm4, %v930_v4, %v934_v5 }
  0x37   : > { %1358 = vmatpush3.bf16.msra.mxu1 %v1461_v2  ;;  %1371 = vmatprep.subr.bf16.mxu0 %v1466_v31  ;;  %v1246_v2 = vcombine.low %v769_v50, %v783_v0  ;;  %v1260_v7 = vcombine.low %v783_v0, %v935_v6 }
  0x38   : > { %1359 = vmatprep.subr.bf16.mxu1 %v1463_v29 }
  0x3a   : > { %1372 = vmatpush3.bf16.msra.mxu0 %v1466_v31 }
  0x3b   : > { %1360 = vmatpush3.bf16.msra.mxu1 %v1463_v29 }
  0x3d   : > { %1330 = vmatmul.mubr.bf16.gmra.mxu0 %v1222_v53 }
  0x3e   : > { %1362 = vmatmul.mubr.msk.bf16.vlgmr.msra.gmra.mxu1 %vm832_vm3, %v1244_v52  ;;  %1373 = vmatprep.mubr.msk.bf16.mxu0 %vm953_vm5, %v1257_v56 }
  0x3f   : > { %1365 = vmatprep.mubr.msk.bf16.mxu1 %vm832_vm3, %v1245_v58 }
  0x45   : > { %1374 = vmatmul.mubr.msk.bf16.vlgmr.msra.gmra.mxu0 %vm953_vm5, %v1258_v1 }
  0x46   : > { %1366 = vmatmul.mubr.msk.bf16.gmra.mxu1 %vm832_vm3, %v1246_v2  ;;  %1377 = vmatprep.mubr.msk.bf16.mxu0 %vm953_vm5, %v1259_v3 }
  0x4d   : > { %1378 = vmatmul.mubr.msk.bf16.gmra.mxu0 %vm953_vm5, %v1260_v7 }
  0xe6   : > { %v1343_v8 = vpop.f32.mrf.mxu1 }
  0xe8   : > { %v618_v10 = vpop.f32.mrf.mxu1 }
  0xea   : > { %v1344_v12 = vpop.f32.mrf.mxu1 }
  0xec   : > { %v621_v13 = vpop.f32.mrf.mxu1 }
  0xee   : > { %v1347_v14 = vpop.f32.mrf.mxu1 }
  0xf0   : > { %v634_v15 = vpop.f32.mrf.mxu1 }
  0xf2   : > { %v1348_v18 = vpop.f32.mrf.mxu1 }
  0xf4   : > { %v637_v22 = vpop.f32.mrf.mxu1 }
  0xf5   : > { %v1327_v16 = vpop.f32.mrf.mxu0 }
  0xf6   : > { %v527_v25 = vadd.f32 %v1327_v16, %v1218_v11 }
  0xf7   : > { %v494_v19 = vpop.f32.mrf.mxu0 }
  0xf8   : > { %v525_v17 = vadd.f32 %v1218_v11, %v494_v19  ;;  %v651_v29 = vadd.f32 %v1343_v8, %v527_v25 }
  0xf9   : > { %v1328_v20 = vpop.f32.mrf.mxu0 }
  0xfa   : > { %v528_v28 = vadd.f32 %v1328_v20, %v1218_v11  ;;  %v649_v34 = vadd.f32 %v618_v10, %v525_v17 }
  0xfb   : > { %v497_v23 = vpop.f32.mrf.mxu0 }
  0xfc   : > { %v526_v32 = vadd.f32 %v1218_v11, %v497_v23  ;;  %v652_v40 = vadd.f32 %v1344_v12, %v528_v28 }
  0xfd   : > { %v1331_v24 = vpop.f32.mrf.mxu0 }
  0xfe   : > { %v1363_v26 = vpop.f32.mrf.mxu1  ;;  %v531_v37 = vadd.f32 %v1331_v24, %v1218_v11  ;;  %v650_v38 = vadd.f32 %v621_v13, %v526_v32 }
  0xff   : > { %v510_v9 = vpop.f32.mrf.mxu0  ;;  %v912_v33 = vadd.f32 %v1363_v26, %v651_v29 }
 0x100   : > { %v879_v27 = vpop.f32.mrf.mxu1  ;;  %v529_v44 = vadd.f32 %v1218_v11, %v510_v9  ;;  %v655_v54 = vadd.f32 %v1347_v14, %v531_v37 }
 0x101   : > { %v1332_v21 = vpop.f32.mrf.mxu0  ;;  %v910_v39 = vadd.f32 %v879_v27, %v649_v34 }
 0x102   : > { %v1364_v30 = vpop.f32.mrf.mxu1  ;;  %v532_v51 = vadd.f32 %v1332_v21, %v1218_v11  ;;  %v653_v59 = vadd.f32 %v634_v15, %v529_v44 }
 0x103   : > { %v513_v31 = vpop.f32.mrf.mxu0  ;;  %v913_v46 = vadd.f32 %v1364_v30, %v652_v40 }
 0x104   : > { %v882_v35 = vpop.f32.mrf.mxu1  ;;  %v530_v57 = vadd.f32 %v1218_v11, %v513_v31  ;;  %v656_v63 = vadd.f32 %v1348_v18, %v532_v51 }
 0x105   : > { %v1375_v36 = vpop.f32.mrf.mxu0  ;;  %v911_v53 = vadd.f32 %v882_v35, %v650_v38 }
 0x106   : > { %v1367_v41 = vpop.f32.mrf.mxu1  ;;  %v1033_v42 = vadd.f32 %v1375_v36, %v912_v33  ;;  %v654_v2 = vadd.f32 %v637_v22, %v530_v57 }
 0x107   : > { %v1000_v43 = vpop.f32.mrf.mxu0  ;;  %v916_v58 = vadd.f32 %v1367_v41, %v655_v54 }
 0x108   : > { %1041 = vst.msk [vmem:[%s1821_s19 + $0x10] sm:$0xff] %vm571_vm0, %v1033_v42  ;;  %v895_v47 = vpop.f32.mrf.mxu1  ;;  %v1031_v48 = vadd.f32 %v1000_v43, %v910_v39 }
 0x109   : > { %v1376_v49 = vpop.f32.mrf.mxu0  ;;  %v914_v62 = vadd.f32 %v895_v47, %v653_v59 }
 0x10a   : > { %1039 = vst.msk [vmem:[%s1821_s19] sm:$0xff] %vm571_vm0, %v1031_v48  ;;  %v1034_v55 = vadd.f32 %v1376_v49, %v913_v46  ;;  %v1368_v52 = vpop.f32.mrf.mxu1 }
 0x10b   : > { %v1003_v56 = vpop.f32.mrf.mxu0  ;;  %v917_v1 = vadd.f32 %v1368_v52, %v656_v63 }
 0x10c   : > { %1042 = vst.msk [vmem:[%s1821_s19 + $0x18] sm:$0xff] %vm571_vm0, %v1034_v55  ;;  %v1032_v60 = vadd.f32 %v1003_v56, %v911_v53  ;;  %v898_v50 = vpop.f32.mrf.mxu1 }
 0x10d   : > { %v1379_v61 = vpop.f32.mrf.mxu0  ;;  %v915_v5 = vadd.f32 %v898_v50, %v654_v2 }
 0x10e   : > { %1040 = vst.msk [vmem:[%s1821_s19 + $0x8] sm:$0xff] %vm571_vm0, %v1032_v60  ;;  %v1037_v45 = vadd.f32 %v1379_v61, %v916_v58 }
 0x10f   : > { %v1016_v0 = vpop.f32.mrf.mxu0 }
 0x110   : > { %1045 = vst.msk [vmem:[%s1821_s19 + $0x30] sm:$0xff] %vm571_vm0, %v1037_v45  ;;  %v1035_v3 = vadd.f32 %v1016_v0, %v914_v62 }
 0x111   : > { %v1380_v4 = vpop.f32.mrf.mxu0 }
 0x112   : > { %1043 = vst.msk [vmem:[%s1821_s19 + $0x20] sm:$0xff] %vm571_vm0, %v1035_v3  ;;  %v1038_v6 = vadd.f32 %v1380_v4, %v917_v1 }
 0x113   : > { %v1019_v7 = vpop.f32.mrf.mxu0 }
 0x114   : > { %1046 = vst.msk [vmem:[%s1821_s19 + $0x38] sm:$0xff] %vm571_vm0, %v1038_v6  ;;  %v1036_v8 = vadd.f32 %v1019_v7, %v915_v5 }
 0x116   : > { %1044 = vst.msk [vmem:[%s1821_s19 + $0x28] sm:$0xff] %vm571_vm0, %v1036_v8 }
 0x117   : > { %1480 = shalt.err (!%p1477_p5)
}
 0x118   : > { %s1481_s13 = scalar_lea.hbm %s1840_s8, 1024  ;;  %s1485_s18 = scalar_lea.hbm %s1901_s6, 2048 }
 0x119   : > { %p1482_p6 = scmp.ne.s32.totalorder %s1840_s8, %s1481_s13  ;;  %p1486_p10 = scmp.lt.s32.totalorder %s1840_s8, %s1901_s6 }
 0x11a   : > { %p1487_p11 = scmp.lt.s32.totalorder %s1485_s18, %s1481_s13 }
 0x11b   : > { %p1483_p7 = pnand %p1482_p6, %p1623_p4 }
 0x11c   : > { %p1488_p12 = por %p1487_p11, %p1486_p10 }
 0x11d   : > { %p1484_p9 = pneg %p1483_p7 }
 0x11f   : > { %p1489_p13 = pnand %p1488_p12, %p1484_p9 }
 0x121   : > { %1492 = shalt.err (!%p1489_p13)
}
 0x122   : > { %s1546_s28 = smov 128   ;;  %s1547_s30 = smov 8  }
 0x123   : > { %1382 = dma.vmem_to_hbm [thread:$0]  (%p1623_p4), %s1842_s27, 1024, %s1840_s8, %s1850_s24, %s1546_s28, %s1546_s28, %s1547_s30  }
 0x124 PF: > { %p1388_p0 = scmp.ge.s32.totalorder %s1543_s26, 2  ;;  %s1077_s11 = sand.u32 1, %s1523_s21  }
 0x125   : > { %s1078_s12 = scalar_lea.sflag [#allocation3], %s1077_s11 }
 0x126   : > { %p1385_p1 = pnand %p1388_p0, %p1630_p8 }
 0x128   : > { %p1386_p2 = pneg %p1385_p1 }
 0x12a   : > { %1518 = dma.done.wait (%p1386_p2), %s1078_s12, 1024  }
 0x12b   : > { %1520 = vsyncadd (%p1386_p2), %s1078_s12, 4294966272  ;;  %s19_s26 = sadd.s32 1, %s1543_s26   ;;  %s1906_s21 = smov %s1527_s22 }
 0x12c   : > { %p16_p3 = scmp.ge.s32.totalorder %s19_s26, 4   ;;  %s1907_s22 = smov %s1531_s23 }
 0x12d   : > { %s1908_s23 = smov %s1636_s10  ;;  %s1909_s24 = smov %s1539_s25 }
 0x12e   : > { %s1910_s25 = smov %s1912_s29  ;;  %18 = sbr.rel (!%p16_p3) target bundleno = 4 (0x4), region = 94 }
 0x133   :  { %1083 = vsyncpa [#allocation3], 1 }
 0x134   :  { %1085 = vsyncpa [#allocation3 + $0x1], 1 }

</bundles_post_ra>
